<compile_context>
chip_gen: v6e
topology: v6e:2x2x1
jax: 0.10.0
libtpu: 0.0.40
codegen_flags: <defaults>
</compile_context>

<pallas_src>
import numpy as np

import jax
import jax.numpy as jnp
from jax.experimental import pallas as pl
from jax.experimental.pallas import tpu as pltpu


# ----------------------------------------------------------------------------
# Kernel
# ----------------------------------------------------------------------------
def _concat_kernel(*refs):
    """refs = (in_ref_0, ..., in_ref_{n-1}, out_ref); all 2D (rows, cols)."""
    *in_refs, o_ref = refs
    off = 0
    for r in in_refs:
        c = r.shape[-1]                      # static per-input column width
        o_ref[:, off:off + c] = r[...]       # static column slice -> dense vst
        off += c


# ----------------------------------------------------------------------------
# Wrapper
# ----------------------------------------------------------------------------
def _pick_row_tile(num_rows: int, total_cols: int, itemsize: int) -> int:
    """Row tile such that (inputs + output), double-buffered, fits VMEM.

    One grid step touches ~2 * tr * total_cols * itemsize bytes (inputs plus
    output); the pipeline double-buffers that -> factor 4.  A ~4 MiB payload
    per step keeps total VMEM use well under the default scoped limit on all
    of v5e / v6e / v7x while being large enough to amortize the ~0.35 us
    per-step overhead and reach the HBM roofline.
    """
    if num_rows <= 8:
        return num_rows
    budget_bytes = 4 * 1024 * 1024
    max_rows = max(8, budget_bytes // max(1, 2 * total_cols * itemsize))
    tr = min(num_rows, max_rows)
    tr = max(8, (tr // 8) * 8)               # keep sublane-aligned (8) tiles
    return tr


def concat(xs, dim: int = 1):
    """Pallas equivalent of torch.cat(xs, dim)."""
    xs = [jnp.asarray(x) for x in xs]
    assert len(xs) >= 1
    ndim = xs[0].ndim
    d = dim % ndim

    # Promote to a common dtype (matches torch.cat type-promotion behaviour).
    dtype = jnp.result_type(*[x.dtype for x in xs])
    xs = [x.astype(dtype) for x in xs]

    lead = xs[0].shape[:d]
    tail = xs[0].shape[d + 1:]
    for x in xs:
        assert x.ndim == ndim
        assert x.shape[:d] == lead and x.shape[d + 1:] == tail

    rows = int(np.prod(lead)) if lead else 1
    cols = [int(np.prod(x.shape[d:])) for x in xs]
    total_cols = int(sum(cols))
    out_shape_full = lead + (sum(x.shape[d] for x in xs),) + tail

    xs2d = [x.reshape(rows, c) for x, c in zip(xs, cols)]
    itemsize = jnp.dtype(dtype).itemsize

    tr = _pick_row_tile(rows, total_cols, itemsize)
    grid = (pl.cdiv(rows, tr),)

    # TODO(synk): for pathologically wide rows (tr*total_cols still > budget),
    # a second (column) grid axis would be needed; not required at these sizes.
    in_specs = [pl.BlockSpec((tr, c), lambda r: (r, 0)) for c in cols]
    out_specs = pl.BlockSpec((tr, total_cols), lambda r: (r, 0))

    out2d = pl.pallas_call(
        _concat_kernel,
        out_shape=jax.ShapeDtypeStruct((rows, total_cols), dtype),
        grid=grid,
        in_specs=in_specs,
        out_specs=out_specs,
        compiler_params=pltpu.CompilerParams(
            dimension_semantics=("parallel",),  # row tiles independent -> 2 TCs on v7x
        ),
    )(*xs2d)

    return out2d.reshape(out_shape_full)


# ----------------------------------------------------------------------------
# Demo / self-check
# ----------------------------------------------------------------------------
if __name__ == "__main__":
    key = jax.random.PRNGKey(0)
    k0, k1, k2 = jax.random.split(key, 3)

    # Small NCHW feature maps with differing channel counts, concat on dim=1
    # (the module's default), mirroring typical YOLO-style Concat usage.
    N, H, W = 2, 16, 16
    x0 = jax.random.normal(k0, (N, 4, H, W), jnp.float32)
    x1 = jax.random.normal(k1, (N, 6, H, W), jnp.float32)
    x2 = jax.random.normal(k2, (N, 8, H, W), jnp.float32)
    xs = [x0, x1, x2]

    out = jax.block_until_ready(concat(xs, dim=1))

    ref = jax.block_until_ready(jnp.concatenate(xs, axis=1))
    assert out.shape == (N, 4 + 6 + 8, H, W), out.shape
    np.testing.assert_array_equal(np.asarray(out), np.asarray(ref))

    # Also exercise a last-dim concat to cover a second dim value.
    y0 = jax.random.normal(k0, (2, 8, 32), jnp.float32)
    y1 = jax.random.normal(k1, (2, 8, 16), jnp.float32)
    out2 = jax.block_until_ready(concat([y0, y1], dim=-1))
    ref2 = jnp.concatenate([y0, y1], axis=-1)
    np.testing.assert_array_equal(np.asarray(out2), np.asarray(ref2))

    print("KERNEL_OK")
</pallas_src>

<mosaic_0001>
module attributes {stable_mosaic.version = 11 : i64} {
  func.func @_concat_kernel(%arg0: i32, %arg1: memref<2x1024xf32, #tpu.memory_space<vmem>>, %arg2: memref<2x1536xf32, #tpu.memory_space<vmem>>, %arg3: memref<2x2048xf32, #tpu.memory_space<vmem>>, %arg4: memref<2x4608xf32, #tpu.memory_space<vmem>>) attributes {dimension_semantics = [#tpu.dimension_semantics<parallel>], iteration_bounds = array<i64: 1>, scalar_prefetch = 0 : i64, scratch_operands = 0 : i64, tpu.core_type = #tpu.core_type<tc>, window_params = [{transform_indices = @transform_0, window_bounds = array<i64: 2, 1024>}, {transform_indices = @transform_1, window_bounds = array<i64: 2, 1536>}, {transform_indices = @transform_2, window_bounds = array<i64: 2, 2048>}, {transform_indices = @transform_3, window_bounds = array<i64: 2, 4608>}]} {
    %c0 = arith.constant 0 : index
    %c0_0 = arith.constant 0 : index
    %0 = vector.load %arg1[%c0, %c0_0] : memref<2x1024xf32, #tpu.memory_space<vmem>>, vector<2x1024xf32>
    %c0_1 = arith.constant 0 : index
    %c0_2 = arith.constant 0 : index
    %1 = vector.load %arg4[%c0_1, %c0_2] : memref<2x4608xf32, #tpu.memory_space<vmem>>, vector<2x1024xf32>
    tpu.vector_store %arg4[%c0_1, %c0_2], %0 {strides = array<i32>} : memref<2x4608xf32, #tpu.memory_space<vmem>>, vector<2x1024xf32>,
    %c0_3 = arith.constant 0 : index
    %c0_4 = arith.constant 0 : index
    %2 = vector.load %arg2[%c0_3, %c0_4] : memref<2x1536xf32, #tpu.memory_space<vmem>>, vector<2x1536xf32>
    %c0_5 = arith.constant 0 : index
    %c1024 = arith.constant 1024 : index
    %3 = vector.load %arg4[%c0_5, %c1024] : memref<2x4608xf32, #tpu.memory_space<vmem>>, vector<2x1536xf32>
    tpu.vector_store %arg4[%c0_5, %c1024], %2 {strides = array<i32>} : memref<2x4608xf32, #tpu.memory_space<vmem>>, vector<2x1536xf32>,
    %c0_6 = arith.constant 0 : index
    %c0_7 = arith.constant 0 : index
    %4 = vector.load %arg3[%c0_6, %c0_7] : memref<2x2048xf32, #tpu.memory_space<vmem>>, vector<2x2048xf32>
    %c0_8 = arith.constant 0 : index
    %c2560 = arith.constant 2560 : index
    %5 = vector.load %arg4[%c0_8, %c2560] : memref<2x4608xf32, #tpu.memory_space<vmem>>, vector<2x2048xf32>
    tpu.vector_store %arg4[%c0_8, %c2560], %4 {strides = array<i32>} : memref<2x4608xf32, #tpu.memory_space<vmem>>, vector<2x2048xf32>,
    return
  }
  func.func @transform_0(%arg0: i32) -> (i32, i32) {
    %c0_i32 = arith.constant 0 : i32
    %c0_i32_0 = arith.constant 0 : i32
    return %arg0, %c0_i32 : i32, i32
  }
  func.func @transform_1(%arg0: i32) -> (i32, i32) {
    %c0_i32 = arith.constant 0 : i32
    %c0_i32_0 = arith.constant 0 : i32
    return %arg0, %c0_i32 : i32, i32
  }
  func.func @transform_2(%arg0: i32) -> (i32, i32) {
    %c0_i32 = arith.constant 0 : i32
    %c0_i32_0 = arith.constant 0 : i32
    return %arg0, %c0_i32 : i32, i32
  }
  func.func @transform_3(%arg0: i32) -> (i32, i32) {
    %c0_i32 = arith.constant 0 : i32
    %c0_i32_0 = arith.constant 0 : i32
    return %arg0, %c0_i32 : i32, i32
  }
}

</mosaic_0001>

<bundles_post_ra>
// kernel: tpu_custom_call.1
= control target key start
LH: loop header
LB: loop body
LE: loop exit
PB: predicated region body
PF: predicated region fallthrough
CT: control target
= control target key end

     0   :  { %8 = vsyncpa [#allocation3], 0  ;;  %s210_s0 = inlined_call_operand.hbm [shape: f32[2,1024], index: 0, kind: input, shape index: {}]   ;;  %s211_s1 = inlined_call_operand.hbm [shape: f32[2,1536], index: 1, kind: input, shape index: {}]   ;;  %s212_s2 = inlined_call_operand.hbm [shape: f32[2,2048], index: 2, kind: input, shape index: {}]   ;;  %s213_s3 = inlined_call_operand.hbm [shape: f32[2,4608], index: 3, kind: output, shape index: {}]  }
   0x1   :  { %9 = vsyncpa [#allocation6], 0 }
   0x2   :  { %10 = vsyncpa [#allocation4], 0  ;;  %s174_s12 = smov [#allocation5]   ;;  %s175_s14 = smov [#allocation2]  }
   0x3   :  { %s27_s13 = sshll.u32 %s174_s12, 4  ;;  %s17_s15 = sshll.u32 %s175_s14, 4  ;;  %s28_s13 = int_to_ptr.vmem [resolvable:$true] %s27_s13  ;;  %s18_s15 = int_to_ptr.vmem [resolvable:$true] %s17_s15 }
   0x4   :  { %s96_s16 = scalar_lea.vmem %s28_s13, 384  ;;  %p101_p1 = scmp.lt.s32.totalorder %s28_s13, %s28_s13 }
   0x5   :  { %p97_p0 = scmp.ne.s32.totalorder %s28_s13, %s96_s16  ;;  %p102_p2 = scmp.lt.s32.totalorder %s96_s16, %s96_s16 }
   0x7   :  { %p103_p3 = por %p102_p2, %p101_p1 }
   0x9   :  { %p104_p4 = pnand %p103_p3, %p97_p0 }
   0xb   :  { %107 = shalt.err (!%p104_p4)
}
   0xc   :  { %30 = dma.hbm_to_vmem [thread:$0]  %s211_s1, 384, %s28_s13, [#allocation6]  }
   0xd   :  { %s116_s19 = scalar_lea.vmem %s18_s15, 256  ;;  %p121_p6 = scmp.lt.s32.totalorder %s18_s15, %s18_s15 }
   0xe   :  { %p117_p5 = scmp.ne.s32.totalorder %s18_s15, %s116_s19  ;;  %p122_p7 = scmp.lt.s32.totalorder %s116_s19, %s116_s19 }
  0x10   :  { %p123_p8 = por %p122_p7, %p121_p6 }
  0x12   :  { %p124_p9 = pnand %p123_p8, %p117_p5 }
  0x14   :  { %127 = shalt.err (!%p124_p9)
}
  0x15   :  { %20 = dma.hbm_to_vmem [thread:$0]  %s210_s0, 256, %s18_s15, [#allocation3]  }
  0x16   :  { %s176_s22 = smov [#allocation7]  }
  0x17   :  { %s37_s23 = sshll.u32 %s176_s22, 4  ;;  %s38_s23 = int_to_ptr.vmem [resolvable:$true] %s37_s23 }
  0x18   :  { %s136_s24 = scalar_lea.vmem %s38_s23, 512  ;;  %p141_p11 = scmp.lt.s32.totalorder %s38_s23, %s38_s23 }
  0x19   :  { %p137_p10 = scmp.ne.s32.totalorder %s38_s23, %s136_s24  ;;  %p142_p12 = scmp.lt.s32.totalorder %s136_s24, %s136_s24 }
  0x1b   :  { %p143_p13 = por %p142_p12, %p141_p11 }
  0x1d   :  { %p144_p0 = pnand %p143_p13, %p137_p10 }
  0x1f   :  { %147 = shalt.err (!%p144_p0)
}
  0x20   :  { %40 = dma.hbm_to_vmem [thread:$0]  %s212_s2, 512, %s38_s23, [#allocation6]  }
  0x21   :  { %168 = dma.done.wait [#allocation3], 256  }
  0x22   :  { %169 = vsyncadd [#allocation3], 4294967040 }
  0x23   :  { %170 = dma.done.wait [#allocation6], 896  }
  0x24   :  { %171 = vsyncadd [#allocation6], 4294966400  ;;  %s177_s26 = smov [#allocation8]   ;;  %v50_v0 = vld [vmem:[#allocation2] sm:$0xff]  ;;  %v51_v1 = vld [vmem:[#allocation2 + $0x8] sm:$0xff] }
  0x25   :  { %s74_s0 = sshll.u32 %s177_s26, 4  ;;  %v54_v2 = vld [vmem:[#allocation5] sm:$0xff]  ;;  %52 = vst [vmem:[#allocation8] sm:$0xff] %v50_v0  ;;  %53 = vst [vmem:[#allocation8 + $0x8] sm:$0xff] %v51_v1  ;;  %v55_v3 = vld [vmem:[#allocation5 + $0x8] sm:$0xff]  ;;  %s75_s0 = int_to_ptr.vmem [resolvable:$true] %s74_s0 }
  0x26   :  { %57 = vst [vmem:[#allocation8 + $0x10] sm:$0xff] %v54_v2  ;;  %v56_v4 = vld [vmem:[#allocation5 + $0x10] sm:$0xff]  ;;  %v60_v5 = vld [vmem:[#allocation7] sm:$0xff]  ;;  %58 = vst [vmem:[#allocation8 + $0x18] sm:$0xff] %v55_v3  ;;  %s148_s2 = scalar_lea.vmem %s75_s0, 1152  ;;  %p153_p2 = scmp.lt.s32.totalorder %s75_s0, %s75_s0 }
  0x27   :  { %59 = vst [vmem:[#allocation8 + $0x20] sm:$0xff] %v56_v4  ;;  %64 = vst [vmem:[#allocation8 + $0x28] sm:$0xff] %v60_v5  ;;  %v61_v6 = vld [vmem:[#allocation7 + $0x8] sm:$0xff]  ;;  %v62_v7 = vld [vmem:[#allocation7 + $0x10] sm:$0xff]  ;;  %p149_p1 = scmp.ne.s32.totalorder %s75_s0, %s148_s2  ;;  %p154_p3 = scmp.lt.s32.totalorder %s148_s2, %s148_s2 }
  0x28   :  { %v63_v8 = vld [vmem:[#allocation7 + $0x18] sm:$0xff]  ;;  %65 = vst [vmem:[#allocation8 + $0x30] sm:$0xff] %v61_v6  ;;  %66 = vst [vmem:[#allocation8 + $0x38] sm:$0xff] %v62_v7 }
  0x29   :  { %67 = vst [vmem:[#allocation8 + $0x40] sm:$0xff] %v63_v8  ;;  %p155_p4 = por %p154_p3, %p153_p2 }
  0x2b   :  { %p156_p5 = pnand %p155_p4, %p149_p1 }
  0x2d   :  { %159 = shalt.err (!%p156_p5)
}
  0x2e   :  { %77 = dma.vmem_to_hbm [thread:$0]  %s75_s0, 1152, %s213_s3, [#allocation4]  }
  0x2f   :  { %172 = dma.done.wait [#allocation4], 1152  }
  0x30   :  { %173 = vsyncadd [#allocation4], 4294966144 }
  0x31   :  { %81 = vsyncpa [#allocation3], 1 }
  0x32   :  { %82 = vsyncpa [#allocation6], 1 }
  0x33   :  { %83 = vsyncpa [#allocation4], 1 }

</bundles_post_ra>
